<compile_context>
chip_gen: v7x
topology: tpu7x:2x2x1
jax: 0.10.0
libtpu: 0.0.40
codegen_flags: <defaults>
</compile_context>

<pallas_src>
import jax
import jax.numpy as jnp
from jax.experimental import pallas as pl
from jax.experimental.pallas import tpu as pltpu


def _linear_kernel(x_ref, w_ref, b_ref, o_ref, acc_ref):
    # x_ref: (TILE_B, TILE_D) VMEM     w_ref: (1, TILE_D) VMEM
    # b_ref: (1, 1) SMEM scalar        o_ref: (1, TILE_B) VMEM (lane-dense)
    # acc_ref: (1, TILE_B) f32 VMEM scratch, resident across the D axis.
    k = pl.program_id(1)

    @pl.when(k == 0)
    def _init():
        acc_ref[...] = jnp.zeros_like(acc_ref)

    # Multiply in the input dtype (bf16 stays bf16 on v6e/v7x), accumulate f32.
    prod = (x_ref[...] * w_ref[...]).astype(jnp.float32)   # (TILE_B, TILE_D)
    acc_ref[...] += jnp.sum(prod, axis=-1)[None, :]         # VPU + XLU lane reduce

    @pl.when(k == pl.num_programs(1) - 1)
    def _finalize():
        o_ref[...] = (acc_ref[...] + b_ref[0, 0]).astype(o_ref.dtype)


def _round_up(v, m):
    return ((v + m - 1) // m) * m


def _choose_tiles(batch: int, feat: int, itemsize: int):
    """Bytes-based tile selection: (TILE_B, TILE_D)."""
    target = 4 << 20   # soft per-buffer target for the x tile
    hard = 8 << 20     # hard per-buffer cap for the x tile

    # ---- batch tile ----
    if batch < 256:
        # Too small to give both v7x TCs a >=128-row tile each; keep one full
        # batch block (block dims equal to full array dims are always legal).
        tb = batch
    elif batch * feat * itemsize <= target:
        # Whole x would fit in one buffer, but force >=2 grid steps so the
        # "parallel" batch axis shards across both v7x TensorCores.
        tb = max(128, _round_up(pl.cdiv(batch, 2), 128))
    else:
        rows = max(128, (target // max(1, feat * itemsize)) // 128 * 128)
        split_cap = max(128, _round_up(pl.cdiv(batch, 2), 128))
        tb = min(rows, split_cap)

    # ---- feature (reduction) tile ----
    if tb * feat * itemsize <= hard:
        td = feat
    else:
        # Largest 128-multiple divisor of D under the cap (exact divisor =>
        # the reduction never sees a partial, undefined-padded block).
        max_cols = max(128, (hard // max(1, tb * itemsize)) // 128 * 128)
        td = None
        c = (min(feat, max_cols) // 128) * 128
        while c >= 128:
            if feat % c == 0:
                td = c
                break
            c -= 128
        if td is None:
            # TODO(synk): no clean 128-multiple divisor of D; fall back to a
            # full-D row tile (a masked partial-D reduction is not implemented).
            td = feat

    return tb, td


def simple_model_forward(x, weight, bias):
    """x: (B, D), weight: (1, D), bias: (1,)  ->  (B, 1), same dtype as x."""
    B, D = x.shape
    itemsize = x.dtype.itemsize
    tb, td = _choose_tiles(B, D, itemsize)
    nb = pl.cdiv(B, tb)          # batch tiles (last one may be partial)
    nd = D // td                 # reduction tiles (td divides D by construction)

    b_smem = bias.reshape(1, 1).astype(jnp.float32)

    x_buf_bytes = tb * td * itemsize
    vmem_limit = max(32 << 20, 2 * x_buf_bytes + 2 * td * itemsize + (6 << 20))

    cost = pl.CostEstimate(
        flops=2 * B * D,
        transcendentals=0,
        bytes_accessed=B * D * itemsize + D * itemsize + B * itemsize,
    )

    out = pl.pallas_call(
        _linear_kernel,
        out_shape=jax.ShapeDtypeStruct((1, B), x.dtype),
        grid=(nb, nd),
        in_specs=[
            pl.BlockSpec((tb, td), lambda i, k: (i, k)),          # stream x tiles
            pl.BlockSpec((1, td), lambda i, k: (0, k)),           # weight tiles
            pl.BlockSpec(memory_space=pltpu.MemorySpace.SMEM),    # scalar bias
        ],
        out_specs=pl.BlockSpec((1, tb), lambda i, k: (0, i)),     # lane-dense output
        scratch_shapes=[pltpu.VMEM((1, tb), jnp.float32)],        # f32 accumulator
        compiler_params=pltpu.CompilerParams(
            dimension_semantics=("parallel", "arbitrary"),
            vmem_limit_bytes=int(vmem_limit),
        ),
        cost_estimate=cost,
    )(x, weight, b_smem)

    # (1, B) lane-dense slab -> (B, 1) column.
    return out.reshape(B, 1)


if __name__ == "__main__":
    key = jax.random.PRNGKey(0)
    k_x, k_w, k_b = jax.random.split(key, 3)

    batch, input_dim = 8, 32

    x = jax.random.normal(k_x, (batch, input_dim), dtype=jnp.float32)
    # Mimic nn.Linear's uniform(-1/sqrt(D), 1/sqrt(D)) init, deterministically.
    bound = 1.0 / jnp.sqrt(jnp.float32(input_dim))
    weight = jax.random.uniform(k_w, (1, input_dim), minval=-bound, maxval=bound,
                                dtype=jnp.float32)
    bias = jax.random.uniform(k_b, (1,), minval=-bound, maxval=bound,
                              dtype=jnp.float32)

    out = simple_model_forward(x, weight, bias)
    jax.block_until_ready(out)

    # Cross-check against plain JAX reference.
    ref = x @ weight.T + bias
    assert out.shape == (batch, 1)
    assert jnp.allclose(out, ref, atol=1e-5, rtol=1e-5)

    print("KERNEL_OK")
</pallas_src>

<mosaic_0001>
module attributes {stable_mosaic.version = 11 : i64} {
  func.func @_linear_kernel(%arg0: i32, %arg1: i32, %arg2: memref<8x32xf32, #tpu.memory_space<vmem>>, %arg3: memref<1x32xf32, #tpu.memory_space<vmem>>, %arg4: memref<1x1xf32, #tpu.memory_space<smem>>, %arg5: memref<1x8xf32, #tpu.memory_space<vmem>>, %arg6: memref<1x8xf32, #tpu.memory_space<vmem>>) attributes {dimension_semantics = [#tpu.dimension_semantics<parallel>, #tpu.dimension_semantics<arbitrary>], iteration_bounds = array<i64: 1, 1>, scalar_prefetch = 0 : i64, scratch_operands = 1 : i64, tpu.core_type = #tpu.core_type<tc>, window_params = [{transform_indices = @transform_0, window_bounds = array<i64: 8, 32>}, {transform_indices = @transform_1, window_bounds = array<i64: 1, 32>}, {transform_indices = @transform_2, window_bounds = array<i64: 1, 1>}, {transform_indices = @transform_3, window_bounds = array<i64: 1, 8>}]} {
    %c0_i32 = arith.constant 0 : i32
    %0 = arith.cmpi eq, %arg1, %c0_i32 : i32
    %1 = arith.extui %0 : i1 to i32
    %c0_i32_0 = arith.constant 0 : i32
    %2 = arith.cmpi ne, %1, %c0_i32_0 : i32
    scf.if %2 {
      %cst_10 = arith.constant 0.000000e+00 : f32
      %15 = vector.broadcast %cst_10 : f32 to vector<1x8xf32>
      %c0_11 = arith.constant 0 : index
      %c0_12 = arith.constant 0 : index
      %16 = vector.load %arg6[%c0_11, %c0_12] : memref<1x8xf32, #tpu.memory_space<vmem>>, vector<1x8xf32>
      tpu.vector_store %arg6[%c0_11, %c0_12], %15 {strides = array<i32>} : memref<1x8xf32, #tpu.memory_space<vmem>>, vector<1x8xf32>,
    } else {
    }
    %c0 = arith.constant 0 : index
    %c0_1 = arith.constant 0 : index
    %3 = vector.load %arg2[%c0, %c0_1] : memref<8x32xf32, #tpu.memory_space<vmem>>, vector<8x32xf32>
    %c0_2 = arith.constant 0 : index
    %c0_3 = arith.constant 0 : index
    %4 = vector.load %arg3[%c0_2, %c0_3] : memref<1x32xf32, #tpu.memory_space<vmem>>, vector<1x32xf32>
    %5 = vector.broadcast %4 : vector<1x32xf32> to vector<8x32xf32>
    %6 = arith.mulf %3, %5 : vector<8x32xf32>
    %c0_4 = arith.constant 0 : index
    %c0_5 = arith.constant 0 : index
    %7 = vector.load %arg6[%c0_4, %c0_5] : memref<1x8xf32, #tpu.memory_space<vmem>>, vector<1x8xf32>
    %cst = arith.constant dense<0.000000e+00> : vector<8xf32>
    %8 = vector.multi_reduction <add>, %6, %cst [1] : vector<8x32xf32> to vector<8xf32>
    %9 = vector.shape_cast %8 : vector<8xf32> to vector<1x8xf32>
    %10 = arith.addf %7, %9 : vector<1x8xf32>
    %c0_6 = arith.constant 0 : index
    %c0_7 = arith.constant 0 : index
    %11 = vector.load %arg6[%c0_6, %c0_7] : memref<1x8xf32, #tpu.memory_space<vmem>>, vector<1x8xf32>
    tpu.vector_store %arg6[%c0_6, %c0_7], %10 {strides = array<i32>} : memref<1x8xf32, #tpu.memory_space<vmem>>, vector<1x8xf32>,
    %c0_i32_8 = arith.constant 0 : i32
    %12 = arith.cmpi eq, %arg1, %c0_i32_8 : i32
    %13 = arith.extui %12 : i1 to i32
    %c0_i32_9 = arith.constant 0 : i32
    %14 = arith.cmpi ne, %13, %c0_i32_9 : i32
    scf.if %14 {
      %c0_10 = arith.constant 0 : index
      %c0_11 = arith.constant 0 : index
      %15 = vector.load %arg6[%c0_10, %c0_11] : memref<1x8xf32, #tpu.memory_space<vmem>>, vector<1x8xf32>
      %c0_12 = arith.constant 0 : index
      %c0_13 = arith.constant 0 : index
      %16 = memref.load %arg4[%c0_12, %c0_13] : memref<1x1xf32, #tpu.memory_space<smem>>
      %17 = vector.broadcast %16 : f32 to vector<1x8xf32>
      %18 = arith.addf %15, %17 : vector<1x8xf32>
      %c0_14 = arith.constant 0 : index
      %c0_15 = arith.constant 0 : index
      %19 = vector.load %arg5[%c0_14, %c0_15] : memref<1x8xf32, #tpu.memory_space<vmem>>, vector<1x8xf32>
      tpu.vector_store %arg5[%c0_14, %c0_15], %18 {strides = array<i32>} : memref<1x8xf32, #tpu.memory_space<vmem>>, vector<1x8xf32>,
    } else {
    }
    return
  }
  func.func @transform_0(%arg0: i32, %arg1: i32) -> (i32, i32) {
    %c0_i32 = arith.constant 0 : i32
    return %arg0, %arg1 : i32, i32
  }
  func.func @transform_1(%arg0: i32, %arg1: i32) -> (i32, i32) {
    %c0_i32 = arith.constant 0 : i32
    %c0_i32_0 = arith.constant 0 : i32
    return %c0_i32, %arg1 : i32, i32
  }
  func.func @transform_2(%arg0: i32, %arg1: i32) -> (i32, i32) {
    %c0_i32 = arith.constant 0 : i32
    %c0_i32_0 = arith.constant 0 : i32
    %c0_i32_1 = arith.constant 0 : i32
    return %c0_i32, %c0_i32_0 : i32, i32
  }
  func.func @transform_3(%arg0: i32, %arg1: i32) -> (i32, i32) {
    %c0_i32 = arith.constant 0 : i32
    %c0_i32_0 = arith.constant 0 : i32
    return %c0_i32, %arg0 : i32, i32
  }
}

</mosaic_0001>

<bundles_post_ra>
// kernel: tpu_custom_call.1
= control target key start
LH: loop header
LB: loop body
LE: loop exit
PB: predicated region body
PF: predicated region fallthrough
CT: control target
= control target key end

     0   :  { %9 = vsyncpa [#allocation5], 0  ;;  %s293_s0 = inlined_call_operand.hbm [shape: f32[8,32], index: 0, kind: input, shape index: {}]   ;;  %s294_s1 = inlined_call_operand.vmem [shape: f32[1,32], index: 1, kind: input, shape index: {}]   ;;  %s295_s2 = inlined_call_operand.<no memory space> [shape: f32[1,1], index: 2, kind: input, shape index: {}]   ;;  %s296_s3 = inlined_call_operand.hbm [shape: f32[1,8], index: 3, kind: output, shape index: {}]  }
   0x1   :  { %10 = vsyncpa [#allocation6], 0  ;;  %s235_s12 = smov [#allocation4]   ;;  %s187_s16 = scalar_lea.hbm %s293_s0, 128 }
   0x2   :  { %s17_s13 = sshll.u32 %s235_s12, 4  ;;  %p188_p0 = scmp.ne.s32.totalorder %s293_s0, %s187_s16  ;;  %s18_s13 = int_to_ptr.vmem [resolvable:$true] %s17_s13 }
   0x3   :  { %p191_p1 = scmp.lt.u32.totalorder %s187_s16, %s293_s0 }
   0x5   :  { %p193_p2 = pnand %p191_p1, %p188_p0 }
   0x7   :  { %196 = shalt.err (!%p193_p2)
}
   0x8   :  { %s197_s21 = scalar_lea.vmem %s18_s13, 128  ;;  %p202_p4 = scmp.lt.s32.totalorder %s18_s13, %s18_s13 }
   0x9   :  { %p198_p3 = scmp.ne.s32.totalorder %s18_s13, %s197_s21  ;;  %p203_p5 = scmp.lt.s32.totalorder %s197_s21, %s197_s21 }
   0xb   :  { %p204_p6 = por %p203_p5, %p202_p4 }
   0xd   :  { %p205_p7 = pnand %p204_p6, %p198_p3 }
   0xf   :  { %208 = shalt.err (!%p205_p7)
}
  0x10   :  { %20 = dma.hbm_to_vmem [thread:$0]  %s293_s0, 128, %s18_s13, [#allocation5]  }
  0x11   :  { %231 = dma.done.wait [#allocation5], 128  }
  0x12   :  { %232 = vsyncadd [#allocation5], 4294967168  ;;  %v34_v0 = vld [vmem:[#allocation4] sm:$0xff]  ;;  %v180_v1 = vld [vmem:[%s294_s1] ss:$0 sm:$0xff]  ;;  %vm44_vm0 = vcmask 261120   ;;  %v49_v5 = vlaneseq  ;;  %v162_v50 = vstv %s295_s2 }
  0x13   :  { %v42_v2 = vmul.f32 %v180_v1, %v34_v0  ;;  %v236_v4 = vmov 0   ;;  %v237_v9 = vmov 1966171168   ;;  %vm32_vm1 = vcmask 57344   ;;  %s239_s26 = smov [#allocation7]  }
  0x14   :  { %186 = vset.pattern.permute.xlu0 %v236_v4  ;;  %v50_v6 = vshrl.u32 %v49_v5, 7  ;;  %v134_v7 = vand.u32 127, %v49_v5  ;;  %v86_v10 = vunpack.c.l.s4 %v237_v9  ;;  %v238_v43 = vmov 0.0   ;;  %s171_s27 = sshll.u32 %s239_s26, 4  ;;  %s172_s27 = int_to_ptr.vmem [resolvable:$true] %s171_s27 }
  0x15   :  { %v45_v3 = vsel %vm44_vm0, %v42_v2, 0.0  ;;  %33 = vst.msk [vmem:[#allocation2] sm:$0x1] %vm32_vm1, %v238_v43  ;;  %s209_s28 = scalar_lea.vmem %s172_s27, 16  ;;  %s213_s29 = scalar_lea.vmem %s172_s27, 32 }
  0x16   :  { %46 = vadd.xlane.f32.xlu0 %v45_v3  ;;  %v137_v8 = vsub.s32 %v134_v7, %v50_v6  ;;  %v87_v11 = vunpack.c.0.s8 %v86_v10  ;;  %v51_v12 = vsub.s32 0, %v50_v6  ;;  %v55_v13 = vsub.s32 1, %v50_v6  ;;  %p210_p8 = scmp.ne.s32.totalorder %s172_s27, %s209_s28  ;;  %p214_p9 = scmp.lt.s32.totalorder %s172_s27, %s172_s27 }
  0x17   :  { %v59_v14 = vsub.s32 2, %v50_v6  ;;  %v63_v15 = vsub.s32 3, %v50_v6  ;;  %v67_v16 = vsub.s32 4, %v50_v6  ;;  %v71_v17 = vsub.s32 5, %v50_v6  ;;  %p215_p10 = scmp.lt.s32.totalorder %s213_s29, %s209_s28 }
  0x18   :  { %v75_v18 = vsub.s32 6, %v50_v6  ;;  %v79_v19 = vsub.s32 7, %v50_v6  ;;  %v90_v21 = vsub.s32 %v87_v11, %v50_v6 }
  0x19   :  { %p216_p11 = por %p215_p10, %p214_p9 }
  0x1b   :  { %p217_p12 = pnand %p216_p11, %p210_p8 }
  0x1c   :  { %v43_v47 = vld [vmem:[#allocation2] sm:$0x1] }
  0xa3   :  { %v47_v20 = vpop.xlane.xlu0 %46 }
  0xa4   :  { %v52_v22 = vrot.slane %v47_v20, %v51_v12  ;;  %v56_v23 = vrot.slane %v47_v20, %v55_v13  ;;  %v60_v24 = vrot.slane %v47_v20, %v59_v14  ;;  %v64_v25 = vrot.slane %v47_v20, %v63_v15 }
  0xa5   :  { %v68_v26 = vrot.slane %v47_v20, %v67_v16  ;;  %v72_v27 = vrot.slane %v47_v20, %v71_v17  ;;  %v76_v28 = vrot.slane %v47_v20, %v75_v18  ;;  %v80_v29 = vrot.slane %v47_v20, %v79_v19 }
  0xa6   :  { %v81_v30 = vcombine.low %v52_v22, %v56_v23  ;;  %v82_v31 = vcombine.low %v60_v24, %v64_v25 }
  0xa7   :  { %v83_v32 = vcombine.low %v68_v26, %v72_v27  ;;  %v84_v33 = vcombine.low %v76_v28, %v80_v29 }
  0xa8   :  { %v91_v34 = vrot.slane %v81_v30, %v90_v21  ;;  %v98_v35 = vrot.slane %v82_v31, %v90_v21 }
  0xa9   :  { %v105_v36 = vrot.slane %v83_v32, %v90_v21  ;;  %v112_v37 = vrot.slane %v84_v33, %v90_v21 }
  0xaa   :  { %v113_v38 = vcombine.low %v91_v34, %v98_v35 }
  0xab   :  { %v114_v39 = vcombine.low %v105_v36, %v112_v37 }
  0xac   :  { %v121_v40 = vrot.slane %v113_v38, %v90_v21 }
  0xad   :  { %v128_v41 = vrot.slane %v114_v39, %v90_v21 }
  0xaf   :  { %v129_v42 = vcombine.low %v121_v40, %v128_v41 }
  0xb1   :  { %131 = vperm.xlu0 %186, %v129_v42  }
 0x130   :  { %v132_v44 = vpop.permute.xlu0 %131 }
 0x131   :  { %v138_v45 = vrot.slane %v132_v44, %v137_v8 }
 0x133   :  { %v145_v46 = vrot.slane %v138_v45, %v90_v21 }
 0x135   :  { %v152_v48 = vrot.slane %v145_v46, %v90_v21 }
 0x137   :  { %v154_v49 = vadd.f32 %v152_v48, %v43_v47 }
 0x139   :  { %156 = vst.msk [vmem:[#allocation2] sm:$0x1] %vm32_vm1, %v154_v49 }
 0x140   :  { %v160_v51 = vld [vmem:[#allocation2] sm:$0x1] }
 0x141   :  { %v163_v52 = vadd.f32 %v162_v50, %v160_v51 }
 0x143   :  { %164 = vst.msk [vmem:[#allocation7] sm:$0x1] %vm32_vm1, %v163_v52 }
 0x144   :  { %220 = shalt.err (!%p217_p12)
}
 0x145   :  { %s221_s5 = scalar_lea.hbm %s296_s3, 16 }
 0x146   :  { %p222_p13 = scmp.ne.s32.totalorder %s296_s3, %s221_s5  ;;  %p225_p0 = scmp.lt.u32.totalorder %s221_s5, %s296_s3 }
 0x148   :  { %p227_p1 = pnand %p225_p0, %p222_p13 }
 0x14a   :  { %230 = shalt.err (!%p227_p1)
}
 0x14b   :  { %174 = dma.vmem_to_hbm [thread:$0]  %s172_s27, 16, %s296_s3, [#allocation6]  }
 0x14c   :  { %233 = dma.done.wait [#allocation6], 16  }
 0x14d   :  { %234 = vsyncadd [#allocation6], 4294967280 }
 0x14e   :  { %178 = vsyncpa [#allocation5], 1 }
 0x14f   :  { %179 = vsyncpa [#allocation6], 1 }

</bundles_post_ra>
